<compile_context>
chip_gen: v6e
topology: v6e:2x2x1
jax: 0.10.0
libtpu: 0.0.40
codegen_flags: <defaults>
</compile_context>

<pallas_src>
import jax
import jax.numpy as jnp
from jax.experimental import pallas as pl
from jax.experimental.pallas import tpu as pltpu


# ---------------------------------------------------------------------------
# Kernel
# ---------------------------------------------------------------------------
def _relu_kernel(x_ref, o_ref):
    # One VPU max per vreg on the current VMEM tile.
    o_ref[...] = jnp.maximum(x_ref[...], jnp.zeros((), x_ref.dtype))


# ---------------------------------------------------------------------------
# Tuning constants
# ---------------------------------------------------------------------------
_SMALL_INPUT_BYTES = 512 * 1024           # below this, XLA-fused ReLU wins
_TARGET_BLOCK_BYTES = 4 * 1024 * 1024     # ~4 MiB blocks: fewer grid steps,
                                          # live VMEM ~16 MiB (double-buffered)
_VMEM_LIMIT_BYTES = 32 * 1024 * 1024      # explicit limit so 4 MiB blocks are
                                          # safe on v5e's 16 MiB default scoped
_LANE_WIDTHS = (4096, 2048, 1024, 512, 256, 128)
_MAX_LANE_WIDTH = 4096                    # wider lane slabs buy nothing and
                                          # starve the row axis of blocks


def _cdiv(a: int, b: int) -> int:
    return -(-a // b)


def _round_up(a: int, m: int) -> int:
    return _cdiv(a, m) * m


# ---------------------------------------------------------------------------
# Tile selection
# ---------------------------------------------------------------------------
def _choose_row_tile(rows: int, padded_row_bytes: int) -> int:
    """Row tile (multiple of 32 sublanes) sized to ~_TARGET_BLOCK_BYTES, and
    capped so the 1-D grid has >= 2 blocks (ideally an even count) so both
    v7x TensorCores get work."""
    tr = _TARGET_BLOCK_BYTES // max(1, padded_row_bytes)
    tr = max(32, (tr // 32) * 32)
    tr = min(tr, rows)
    if rows >= 64:
        # At least 2 blocks on the parallel axis.
        half = max(32, ((rows // 2) // 32) * 32)
        tr = min(tr, half)
        # Nudge toward an even block count for a balanced 2-way TC split.
        nblk = _cdiv(rows, tr)
        if nblk > 1 and nblk % 2 == 1:
            tr_even = max(32, _round_up(_cdiv(rows, nblk + 1), 32))
            if _cdiv(rows, tr_even) % 2 == 0:
                tr = tr_even
    return tr


def _best_lane_width(shape, total: int) -> int | None:
    """Widest lane-dense (multiple-of-128) flattening width <= _MAX_LANE_WIDTH.

    Prefers widths that leave >= 64 rows so the row grid can still be split
    across both v7x TensorCores. Returns None if no 128-divisible flattening
    exists (the caller then falls back to the model's last dim)."""
    candidates = set()
    # Fold trailing dims: any product divisible by 128 keeps stores unmasked.
    p = 1
    for d in reversed(shape):
        p *= int(d)
        if p % 128 == 0 and p <= _MAX_LANE_WIDTH:
            candidates.add(p)
    # Power-of-two widths dividing the flattened element count.
    for w in _LANE_WIDTHS:
        if total % w == 0:
            candidates.add(w)
    if not candidates:
        return None
    with_enough_rows = [w for w in candidates if total // w >= 64]
    return max(with_enough_rows) if with_enough_rows else max(candidates)


# ---------------------------------------------------------------------------
# Pallas launcher
# ---------------------------------------------------------------------------
def _relu_pallas_2d(x2: jax.Array, *, donate: bool = False) -> jax.Array:
    """Tiled Pallas ReLU on a 2-D slab [rows, width]."""
    rows, width = x2.shape
    itemsize = jnp.dtype(x2.dtype).itemsize
    padded_row_bytes = _round_up(width, 128) * itemsize
    aliases = {0: 0} if donate else {}

    if 32 * padded_row_bytes <= _TARGET_BLOCK_BYTES:
        # ----- 1-D grid over rows: full-width, lane-dense blocks -----------
        tr = _choose_row_tile(rows, padded_row_bytes)
        return pl.pallas_call(
            _relu_kernel,
            out_shape=jax.ShapeDtypeStruct((rows, width), x2.dtype),
            grid_spec=pltpu.PrefetchScalarGridSpec(
                num_scalar_prefetch=0,
                grid=(_cdiv(rows, tr),),
                in_specs=[pl.BlockSpec((tr, width), lambda i: (i, 0))],
                out_specs=pl.BlockSpec((tr, width), lambda i: (i, 0)),
            ),
            compiler_params=pltpu.CompilerParams(
                dimension_semantics=("parallel",),
                vmem_limit_bytes=_VMEM_LIMIT_BYTES,
            ),
            input_output_aliases=aliases,
        )(x2)

    # ----- 2-D grid: rows are too wide, tile the lane axis as well ---------
    # (rank-1 / huge non-128-divisible last dims): block width is a large
    # multiple of 128; Pallas masks the ragged lane tail.
    if rows >= 32:
        tr = 32
    elif rows >= 8:
        tr = (rows // 8) * 8
    else:
        tr = rows  # equals full extent -> allowed by the (8,128) rule
    tw = _TARGET_BLOCK_BYTES // max(1, tr * itemsize)
    tw = max(128, (tw // 128) * 128)
    tw = min(tw, max(128, (width // 128) * 128))

    return pl.pallas_call(
        _relu_kernel,
        out_shape=jax.ShapeDtypeStruct((rows, width), x2.dtype),
        grid_spec=pltpu.PrefetchScalarGridSpec(
            num_scalar_prefetch=0,
            grid=(_cdiv(rows, tr), _cdiv(width, tw)),
            in_specs=[pl.BlockSpec((tr, tw), lambda i, j: (i, j))],
            out_specs=pl.BlockSpec((tr, tw), lambda i, j: (i, j)),
        ),
        compiler_params=pltpu.CompilerParams(
            dimension_semantics=("parallel", "parallel"),
            vmem_limit_bytes=_VMEM_LIMIT_BYTES,
        ),
        input_output_aliases=aliases,
    )(x2)


# ---------------------------------------------------------------------------
# Public wrapper (matches RectifiedLinear.forward semantics exactly)
# ---------------------------------------------------------------------------
def rectified_linear(x: jax.Array, *, donate: bool = False) -> jax.Array:
    """ReLU for any rank >= 0; shape and dtype are preserved.

    Set donate=True (and donate the argument at the jit boundary) to alias the
    output onto the input buffer and avoid a separate HBM allocation.
    """
    orig_shape = x.shape
    total = 1
    for s in orig_shape:
        total *= int(s)
    itemsize = jnp.dtype(x.dtype).itemsize

    # Fast path: tiny tensors — launch overhead would dwarf the work.
    if total * itemsize < _SMALL_INPUT_BYTES:
        return jnp.maximum(x, jnp.zeros((), x.dtype))

    lane_width = _best_lane_width(orig_shape, total)
    if lane_width is None:
        # No 128-divisible flattening exists: keep the model's last dim as the
        # lane axis; the 2-D lane-tiled path bounds the block width if needed.
        lane_width = int(orig_shape[-1])

    x2 = x.reshape(total // lane_width, lane_width)
    out2 = _relu_pallas_2d(x2, donate=donate)
    return out2.reshape(orig_shape)


# ---------------------------------------------------------------------------
# Self-test
# ---------------------------------------------------------------------------
if __name__ == "__main__":
    key = jax.random.PRNGKey(0)
    k1, k2, k3, k4 = jax.random.split(key, 4)

    # 1) Small module-scale input (batch=2, seq=8, dim=32) -> fast path.
    x_small = jax.random.normal(k1, (2, 8, 32), dtype=jnp.float32)
    y_small = jax.block_until_ready(rectified_linear(x_small))
    assert y_small.shape == x_small.shape and y_small.dtype == x_small.dtype
    assert bool(jnp.all(y_small == jnp.maximum(x_small, 0.0)))

    # 2) Activation-sized input -> lane-dense 1-D Pallas path (2 even blocks).
    x_big = jax.random.normal(k2, (4, 128, 512), dtype=jnp.float32)
    y_big = jax.block_until_ready(rectified_linear(x_big))
    assert y_big.shape == x_big.shape and y_big.dtype == x_big.dtype
    assert bool(jnp.all(y_big == jnp.maximum(x_big, 0.0)))

    # 3) Awkward shape (total not 128-divisible) -> 1-D fallback, padded-width
    #    aware sizing, even block count.
    x_odd = jax.random.normal(k3, (9, 260, 130), dtype=jnp.float32)
    y_odd = jax.block_until_ready(rectified_linear(x_odd))
    assert y_odd.shape == x_odd.shape and y_odd.dtype == x_odd.dtype
    assert bool(jnp.all(y_odd == jnp.maximum(x_odd, 0.0)))

    # 4) Huge non-128-divisible last dim -> bounded 2-D lane-tiled path.
    x_wide = jax.random.normal(k4, (3, 180001), dtype=jnp.float32)
    y_wide = jax.block_until_ready(rectified_linear(x_wide))
    assert y_wide.shape == x_wide.shape and y_wide.dtype == x_wide.dtype
    assert bool(jnp.all(y_wide == jnp.maximum(x_wide, 0.0)))

    # 5) Donated / aliased variant (input_output_aliases) under jit.
    expected_big = jnp.maximum(x_big, 0.0)
    relu_donated = jax.jit(lambda t: rectified_linear(t, donate=True),
                           donate_argnums=0)
    y_don = jax.block_until_ready(relu_donated(x_big))
    assert y_don.shape == expected_big.shape and y_don.dtype == expected_big.dtype
    assert bool(jnp.all(y_don == expected_big))

    print("KERNEL_OK")
</pallas_src>

<mosaic_0001>
module attributes {stable_mosaic.version = 11 : i64} {
  func.func @_relu_kernel(%arg0: i32, %arg1: memref<32x4096xf32, #tpu.memory_space<vmem>>, %arg2: memref<32x4096xf32, #tpu.memory_space<vmem>>) attributes {dimension_semantics = [#tpu.dimension_semantics<parallel>], iteration_bounds = array<i64: 2>, scalar_prefetch = 0 : i64, scratch_operands = 0 : i64, tpu.core_type = #tpu.core_type<tc>, window_params = [{transform_indices = @transform_0, window_bounds = array<i64: 32, 4096>}, {transform_indices = @transform_1, window_bounds = array<i64: 32, 4096>}]} {
    %c0 = arith.constant 0 : index
    %c0_0 = arith.constant 0 : index
    %0 = vector.load %arg1[%c0, %c0_0] : memref<32x4096xf32, #tpu.memory_space<vmem>>, vector<32x4096xf32>
    %cst = arith.constant 0.000000e+00 : f32
    %1 = vector.broadcast %cst : f32 to vector<32x4096xf32>
    %2 = arith.maximumf %0, %1 : vector<32x4096xf32>
    %c0_1 = arith.constant 0 : index
    %c0_2 = arith.constant 0 : index
    %3 = vector.load %arg2[%c0_1, %c0_2] : memref<32x4096xf32, #tpu.memory_space<vmem>>, vector<32x4096xf32>
    tpu.vector_store %arg2[%c0_1, %c0_2], %2 {strides = array<i32>} : memref<32x4096xf32, #tpu.memory_space<vmem>>, vector<32x4096xf32>,
    return
  }
  func.func @transform_0(%arg0: i32) -> (i32, i32) {
    %c0_i32 = arith.constant 0 : i32
    %c0_i32_0 = arith.constant 0 : i32
    return %arg0, %c0_i32 : i32, i32
  }
  func.func @transform_1(%arg0: i32) -> (i32, i32) {
    %c0_i32 = arith.constant 0 : i32
    %c0_i32_0 = arith.constant 0 : i32
    return %arg0, %c0_i32 : i32, i32
  }
}

</mosaic_0001>

<bundles_post_ra>
// kernel: tpu_custom_call.1
= control target key start
LH: loop header
LB: loop body
LE: loop exit
PB: predicated region body
PF: predicated region fallthrough
CT: control target
= control target key end

     0   :  { %6 = vsyncpa [#allocation3], 0  ;;  %s1209_s0 = inlined_call_operand.hbm [shape: f32[64,4096], index: 0, kind: input, shape index: {}]   ;;  %s1210_s1 = inlined_call_operand.hbm [shape: f32[64,4096], index: 1, kind: output, shape index: {}]  }
   0x1   :  { %8 = vsyncpa [#allocation3 + $0x1], 0 }
   0x2   :  { %9 = vsyncpa [#allocation4], 0 }
   0x3   :  { %11 = vsyncpa [#allocation4 + $0x1], 0  ;;  %s790_s6 = smov 0   ;;  %s792_s7 = smov 0  }
   0x4   :  { %s794_s8 = smov 0   ;;  %s796_s9 = smov 0  }
   0x5 LB: > { %s811_s10 = sadd.s32 4294967295, %s772_s9   ;;  %s610_s11 = sadd.s32 4294967294, %s772_s9   ;;  %s772_s9 = sphi %s796_s9, %s1225_s9   ;;  %s768_s8 = sphi %s794_s8, %s1224_s8   ;;  %s764_s7 = sphi %s792_s7, %s1223_s7   ;;  %s760_s6 = sphi %s790_s6, %s1222_s6  }
   0x6   : > { %s815_s12 = sadd.s32 1, %s772_s9   ;;  %s24_s13 = sadd.s32 1, %s768_s8 }
   0x7   : > { %s21_s14 = ssub.s32 %s772_s9, %s815_s12  ;;  %p31_p0 = scmp.ne.s32.totalorder %s768_s8, %s764_s7 }
   0x8   : > { %p22_p1 = scmp.eq.s32.totalorder %s21_s14, 0  ;;  %p32_p2 = scmp.eq.s32.totalorder %s772_s9, 0 }
   0x9   : > { %p37_p3 = scmp.ne.s32.totalorder %s764_s7, %s760_s6  ;;  %p38_p4 = scmp.eq.s32.totalorder %s811_s10, 0 }
   0xa   : > { %s827_s15 = scalar_select %p22_p1, %s768_s8, %s24_s13  }
   0xb   : > { %p829_p5 = por %p32_p2, %p31_p0  ;;  %p833_p6 = por %p38_p4, %p37_p3 }
   0xc   : > { %p61_p7 = scmp.eq.s32.totalorder %s811_s10, 1  ;;  %p67_p8 = scmp.eq.s32.totalorder %s610_s11, 1 }
   0xd   : > { %s1214_s17 = scalar_select %p833_p6, 1, 0 }
   0xe   : > { %p642_p10 = scmp.lt.s32.totalorder %s772_s9, 2  ;;  %p840_p11 = por %p61_p7, %p31_p0 }
   0xf   : > { %p844_p12 = por %p67_p8, %p37_p3  ;;  %s87_s20 = sand.u32 1, %s768_s8  }
  0x10   : > { %s1215_s18 = scalar_select %p840_p11, 1, 0 }
  0x11   : > { %s1216_s19 = scalar_select %p844_p12, 1, 0 }
  0x12   : > { %s627_s21 = sshll.u32 %s772_s9, 14  ;;  %s613_s22 = sshll.u32 %s87_s20, 10 }
  0x13   : > { %s853_s25 = scalar_lea.hbm %s1209_s0, %s627_s21  ;;  %s91_s26 = scalar_lea.vmem [#allocation2], %s613_s22 }
  0x14   : > { %s99_s27 = sshll.u32 %s91_s26, 4  ;;  %p857_p13 = pnand %p642_p10, %p829_p5  ;;  %s861_s27 = int_to_ptr.vmem [resolvable:$true] %s99_s27 }
  0x15   : > { %s863_s29 = scalar_lea.sflag [#allocation3], %s87_s20  ;;  %s680_s30 = scalar_lea.hbm %s853_s25, 16384 }
  0x16   : > { %p681_p0 = scmp.ne.s32.totalorder %s853_s25, %s680_s30  ;;  %p682_p1 = pneg %p857_p13 }
  0x17   : > { %s685_s4 = scalar_lea.hbm %s1209_s0, 32768  ;;  %p686_p4 = scmp.lt.s32.totalorder %s853_s25, %s1209_s0 }
  0x18   : > { %p683_p2 = pnand %p682_p1, %p681_p0  ;;  %p687_p5 = scmp.lt.s32.totalorder %s685_s4, %s680_s30 }
  0x1a   : > { %p684_p3 = pneg %p683_p2  ;;  %p688_p7 = por %p687_p5, %p686_p4 }
  0x1c   : > { %p689_p8 = pnand %p688_p7, %p684_p3 }
  0x1e   : > { %692 = shalt.err (!%p689_p8)
}
  0x1f   : > { %s693_s13 = scalar_lea.vmem %s861_s27, 16384  ;;  %s774_s14 = smov [#allocation2]  }
  0x20   : > { %p694_p10 = scmp.ne.s32.totalorder %s861_s27, %s693_s13  ;;  %s698_s16 = sshll.u32 %s774_s14, 4  ;;  %s699_s16 = int_to_ptr.vmem [resolvable:$false] %s698_s16 }
  0x21   : > { %s700_s20 = scalar_lea.vmem %s699_s16, 32768  ;;  %p701_p2 = scmp.lt.s32.totalorder %s861_s27, %s699_s16 }
  0x22   : > { %p696_p9 = pnand %p694_p10, %p682_p1  ;;  %p702_p12 = scmp.lt.s32.totalorder %s700_s20, %s693_s13 }
  0x24   : > { %p697_p0 = pneg %p696_p9  ;;  %p703_p11 = por %p702_p12, %p701_p2 }
  0x26   : > { %p704_p6 = pnand %p703_p11, %p697_p0 }
  0x28   : > { %707 = shalt.err (!%p704_p6)
}
  0x29   : > { %s775_s21 = smov 4096   ;;  %s776_s22 = smov 256  }
  0x2a   : > { %637 = dma.hbm_to_vmem [thread:$0]  (!%p857_p13), %s853_s25, 16384, %s861_s27, %s863_s29, %s775_s21, %s775_s21, %s776_s22  }
  0x2b   : > { %p617_p9 = scmp.ge.s32.totalorder %s772_s9, 1  ;;  %p107_p1 = scmp.lt.s32.totalorder %s772_s9, 3 }
  0x2d   : > { %p108_p3 = pnand %p617_p9, %p107_p1 }
  0x2e   : > { %s887_s23 = sand.u32 (!%p108_p3), 1, %s764_s7   ;;  %p1218_p6 = scmp.ne.s32.totalorder (!%p108_p3), %s1214_s17, 0 }
  0x2f   : > { %111 = sbr.rel (%p108_p3) target bundleno = 140 (0x8c), region = 24  ;;  %s618_s24 = sshll.u32 (!%p108_p3), %s887_s23, 10 }
  0x30   : > { %s114_s26 = scalar_lea.sflag (!%p108_p3), [#allocation3], %s887_s23  ;;  %s891_s30 = scalar_lea.vmem (!%p108_p3), [#allocation2], %s618_s24 }
  0x34   : > { %751 = dma.done.wait (%p1218_p6), %s114_s26, 16384  }
  0x35   : > { %753 = vsyncadd (%p1218_p6), %s114_s26, 4294950912  ;;  %v138_v0 = vld [vmem:[%s891_s30] sm:$0xff]  ;;  %v139_v1 = vld [vmem:[%s891_s30 + $0x8] sm:$0xff]  ;;  %s629_s25 = sshll.u32 %s811_s10, 14  ;;  %s901_s27 = scalar_lea.vmem [#allocation5], %s618_s24 }
  0x36   : > { %v140_v2 = vld [vmem:[%s891_s30 + $0x10] sm:$0xff]  ;;  %s537_s17 = sshll.u32 %s901_s27, 4  ;;  %v266_v3 = vmax.f32 %v138_v0, 0.0  ;;  %v267_v4 = vmax.f32 %v139_v1, 0.0  ;;  %v141_v6 = vld [vmem:[%s891_s30 + $0x18] sm:$0xff]  ;;  %v142_v7 = vld [vmem:[%s891_s30 + $0x20] sm:$0xff]  ;;  %s1154_s2 = scalar_lea.hbm %s1210_s1, %s629_s25  ;;  %s1158_s17 = int_to_ptr.vmem [resolvable:$true] %s537_s17 }
  0x37   : > { %v268_v5 = vmax.f32 %v140_v2, 0.0  ;;  %v143_v8 = vld [vmem:[%s891_s30 + $0x28] sm:$0xff]  ;;  %v269_v9 = vmax.f32 %v141_v6, 0.0  ;;  %v270_v10 = vmax.f32 %v142_v7, 0.0  ;;  %v144_v12 = vld [vmem:[%s891_s30 + $0x30] sm:$0xff]  ;;  %v145_v13 = vld [vmem:[%s891_s30 + $0x38] sm:$0xff] }
  0x38   : > { %v271_v11 = vmax.f32 %v143_v8, 0.0  ;;  %v146_v14 = vld [vmem:[%s891_s30 + $0x40] sm:$0xff]  ;;  %394 = vst [vmem:[%s901_s27] sm:$0xff] %v266_v3  ;;  %395 = vst [vmem:[%s901_s27 + $0x8] sm:$0xff] %v267_v4  ;;  %v272_v15 = vmax.f32 %v144_v12, 0.0  ;;  %v273_v16 = vmax.f32 %v145_v13, 0.0  ;;  %v147_v18 = vld [vmem:[%s891_s30 + $0x48] sm:$0xff] }
  0x39   : > { %396 = vst [vmem:[%s901_s27 + $0x10] sm:$0xff] %v268_v5  ;;  %v274_v17 = vmax.f32 %v146_v14, 0.0  ;;  %v148_v19 = vld [vmem:[%s891_s30 + $0x50] sm:$0xff]  ;;  %v149_v20 = vld [vmem:[%s891_s30 + $0x58] sm:$0xff]  ;;  %397 = vst [vmem:[%s901_s27 + $0x18] sm:$0xff] %v269_v9  ;;  %v275_v21 = vmax.f32 %v147_v18, 0.0 }
  0x3a   : > { %398 = vst [vmem:[%s901_s27 + $0x20] sm:$0xff] %v270_v10  ;;  %399 = vst [vmem:[%s901_s27 + $0x28] sm:$0xff] %v271_v11  ;;  %v276_v22 = vmax.f32 %v148_v19, 0.0  ;;  %v277_v23 = vmax.f32 %v149_v20, 0.0  ;;  %v150_v24 = vld [vmem:[%s891_s30 + $0x60] sm:$0xff]  ;;  %v151_v25 = vld [vmem:[%s891_s30 + $0x68] sm:$0xff] }
  0x3b   : > { %v152_v26 = vld [vmem:[%s891_s30 + $0x70] sm:$0xff]  ;;  %400 = vst [vmem:[%s901_s27 + $0x30] sm:$0xff] %v272_v15  ;;  %401 = vst [vmem:[%s901_s27 + $0x38] sm:$0xff] %v273_v16  ;;  %v278_v27 = vmax.f32 %v150_v24, 0.0  ;;  %v279_v28 = vmax.f32 %v151_v25, 0.0  ;;  %v153_v30 = vld [vmem:[%s891_s30 + $0x78] sm:$0xff] }
  0x3c   : > { %402 = vst [vmem:[%s901_s27 + $0x40] sm:$0xff] %v274_v17  ;;  %v280_v29 = vmax.f32 %v152_v26, 0.0  ;;  %v154_v31 = vld [vmem:[%s891_s30 + $0x80] sm:$0xff]  ;;  %v155_v32 = vld [vmem:[%s891_s30 + $0x88] sm:$0xff]  ;;  %403 = vst [vmem:[%s901_s27 + $0x48] sm:$0xff] %v275_v21  ;;  %v281_v33 = vmax.f32 %v153_v30, 0.0 }
  0x3d   : > { %404 = vst [vmem:[%s901_s27 + $0x50] sm:$0xff] %v276_v22  ;;  %405 = vst [vmem:[%s901_s27 + $0x58] sm:$0xff] %v277_v23  ;;  %v282_v34 = vmax.f32 %v154_v31, 0.0  ;;  %v283_v35 = vmax.f32 %v155_v32, 0.0  ;;  %v156_v36 = vld [vmem:[%s891_s30 + $0x90] sm:$0xff]  ;;  %v157_v37 = vld [vmem:[%s891_s30 + $0x98] sm:$0xff] }
  0x3e   : > { %v158_v38 = vld [vmem:[%s891_s30 + $0xa0] sm:$0xff]  ;;  %406 = vst [vmem:[%s901_s27 + $0x60] sm:$0xff] %v278_v27  ;;  %407 = vst [vmem:[%s901_s27 + $0x68] sm:$0xff] %v279_v28  ;;  %v284_v39 = vmax.f32 %v156_v36, 0.0  ;;  %v285_v40 = vmax.f32 %v157_v37, 0.0  ;;  %v159_v42 = vld [vmem:[%s891_s30 + $0xa8] sm:$0xff] }
  0x3f   : > { %408 = vst [vmem:[%s901_s27 + $0x70] sm:$0xff] %v280_v29  ;;  %v286_v41 = vmax.f32 %v158_v38, 0.0  ;;  %v160_v43 = vld [vmem:[%s891_s30 + $0xb0] sm:$0xff]  ;;  %v161_v44 = vld [vmem:[%s891_s30 + $0xb8] sm:$0xff]  ;;  %409 = vst [vmem:[%s901_s27 + $0x78] sm:$0xff] %v281_v33  ;;  %v287_v45 = vmax.f32 %v159_v42, 0.0 }
  0x40   : > { %410 = vst [vmem:[%s901_s27 + $0x80] sm:$0xff] %v282_v34  ;;  %411 = vst [vmem:[%s901_s27 + $0x88] sm:$0xff] %v283_v35  ;;  %v288_v46 = vmax.f32 %v160_v43, 0.0  ;;  %v289_v47 = vmax.f32 %v161_v44, 0.0  ;;  %v162_v48 = vld [vmem:[%s891_s30 + $0xc0] sm:$0xff]  ;;  %v163_v49 = vld [vmem:[%s891_s30 + $0xc8] sm:$0xff] }
  0x41   : > { %v164_v50 = vld [vmem:[%s891_s30 + $0xd0] sm:$0xff]  ;;  %412 = vst [vmem:[%s901_s27 + $0x90] sm:$0xff] %v284_v39  ;;  %413 = vst [vmem:[%s901_s27 + $0x98] sm:$0xff] %v285_v40  ;;  %v290_v51 = vmax.f32 %v162_v48, 0.0  ;;  %v291_v52 = vmax.f32 %v163_v49, 0.0  ;;  %v165_v54 = vld [vmem:[%s891_s30 + $0xd8] sm:$0xff] }
  0x42   : > { %414 = vst [vmem:[%s901_s27 + $0xa0] sm:$0xff] %v286_v41  ;;  %v292_v53 = vmax.f32 %v164_v50, 0.0  ;;  %v166_v55 = vld [vmem:[%s891_s30 + $0xe0] sm:$0xff]  ;;  %v167_v56 = vld [vmem:[%s891_s30 + $0xe8] sm:$0xff]  ;;  %415 = vst [vmem:[%s901_s27 + $0xa8] sm:$0xff] %v287_v45  ;;  %v293_v57 = vmax.f32 %v165_v54, 0.0 }
  0x43   : > { %416 = vst [vmem:[%s901_s27 + $0xb0] sm:$0xff] %v288_v46  ;;  %417 = vst [vmem:[%s901_s27 + $0xb8] sm:$0xff] %v289_v47  ;;  %v294_v58 = vmax.f32 %v166_v55, 0.0  ;;  %v295_v59 = vmax.f32 %v167_v56, 0.0  ;;  %v168_v60 = vld [vmem:[%s891_s30 + $0xf0] sm:$0xff]  ;;  %v169_v61 = vld [vmem:[%s891_s30 + $0xf8] sm:$0xff] }
  0x44   : > { %v170_v62 = vld [vmem:[%s891_s30 + $0x100] sm:$0xff]  ;;  %418 = vst [vmem:[%s901_s27 + $0xc0] sm:$0xff] %v290_v51  ;;  %419 = vst [vmem:[%s901_s27 + $0xc8] sm:$0xff] %v291_v52  ;;  %v296_v63 = vmax.f32 %v168_v60, 0.0  ;;  %v297_v0 = vmax.f32 %v169_v61, 0.0  ;;  %v171_v2 = vld [vmem:[%s891_s30 + $0x108] sm:$0xff] }
  0x45   : > { %420 = vst [vmem:[%s901_s27 + $0xd0] sm:$0xff] %v292_v53  ;;  %v298_v1 = vmax.f32 %v170_v62, 0.0  ;;  %v172_v3 = vld [vmem:[%s891_s30 + $0x110] sm:$0xff]  ;;  %v173_v4 = vld [vmem:[%s891_s30 + $0x118] sm:$0xff]  ;;  %421 = vst [vmem:[%s901_s27 + $0xd8] sm:$0xff] %v293_v57  ;;  %v299_v5 = vmax.f32 %v171_v2, 0.0 }
  0x46   : > { %422 = vst [vmem:[%s901_s27 + $0xe0] sm:$0xff] %v294_v58  ;;  %423 = vst [vmem:[%s901_s27 + $0xe8] sm:$0xff] %v295_v59  ;;  %v300_v6 = vmax.f32 %v172_v3, 0.0  ;;  %v301_v7 = vmax.f32 %v173_v4, 0.0  ;;  %v174_v8 = vld [vmem:[%s891_s30 + $0x120] sm:$0xff]  ;;  %v175_v9 = vld [vmem:[%s891_s30 + $0x128] sm:$0xff] }
  0x47   : > { %v176_v10 = vld [vmem:[%s891_s30 + $0x130] sm:$0xff]  ;;  %424 = vst [vmem:[%s901_s27 + $0xf0] sm:$0xff] %v296_v63  ;;  %425 = vst [vmem:[%s901_s27 + $0xf8] sm:$0xff] %v297_v0  ;;  %v302_v11 = vmax.f32 %v174_v8, 0.0  ;;  %v303_v12 = vmax.f32 %v175_v9, 0.0  ;;  %v177_v14 = vld [vmem:[%s891_s30 + $0x138] sm:$0xff] }
  0x48   : > { %426 = vst [vmem:[%s901_s27 + $0x100] sm:$0xff] %v298_v1  ;;  %v304_v13 = vmax.f32 %v176_v10, 0.0  ;;  %v178_v15 = vld [vmem:[%s891_s30 + $0x140] sm:$0xff]  ;;  %v179_v16 = vld [vmem:[%s891_s30 + $0x148] sm:$0xff]  ;;  %427 = vst [vmem:[%s901_s27 + $0x108] sm:$0xff] %v299_v5  ;;  %v305_v17 = vmax.f32 %v177_v14, 0.0 }
  0x49   : > { %428 = vst [vmem:[%s901_s27 + $0x110] sm:$0xff] %v300_v6  ;;  %429 = vst [vmem:[%s901_s27 + $0x118] sm:$0xff] %v301_v7  ;;  %v306_v18 = vmax.f32 %v178_v15, 0.0  ;;  %v307_v19 = vmax.f32 %v179_v16, 0.0  ;;  %v180_v20 = vld [vmem:[%s891_s30 + $0x150] sm:$0xff]  ;;  %v181_v21 = vld [vmem:[%s891_s30 + $0x158] sm:$0xff] }
  0x4a   : > { %v182_v22 = vld [vmem:[%s891_s30 + $0x160] sm:$0xff]  ;;  %430 = vst [vmem:[%s901_s27 + $0x120] sm:$0xff] %v302_v11  ;;  %431 = vst [vmem:[%s901_s27 + $0x128] sm:$0xff] %v303_v12  ;;  %v308_v23 = vmax.f32 %v180_v20, 0.0  ;;  %v309_v24 = vmax.f32 %v181_v21, 0.0  ;;  %v183_v26 = vld [vmem:[%s891_s30 + $0x168] sm:$0xff] }
  0x4b   : > { %432 = vst [vmem:[%s901_s27 + $0x130] sm:$0xff] %v304_v13  ;;  %v310_v25 = vmax.f32 %v182_v22, 0.0  ;;  %v184_v27 = vld [vmem:[%s891_s30 + $0x170] sm:$0xff]  ;;  %v185_v28 = vld [vmem:[%s891_s30 + $0x178] sm:$0xff]  ;;  %433 = vst [vmem:[%s901_s27 + $0x138] sm:$0xff] %v305_v17  ;;  %v311_v29 = vmax.f32 %v183_v26, 0.0 }
  0x4c   : > { %434 = vst [vmem:[%s901_s27 + $0x140] sm:$0xff] %v306_v18  ;;  %435 = vst [vmem:[%s901_s27 + $0x148] sm:$0xff] %v307_v19  ;;  %v312_v30 = vmax.f32 %v184_v27, 0.0  ;;  %v313_v31 = vmax.f32 %v185_v28, 0.0  ;;  %v186_v32 = vld [vmem:[%s891_s30 + $0x180] sm:$0xff]  ;;  %v187_v33 = vld [vmem:[%s891_s30 + $0x188] sm:$0xff] }
  0x4d   : > { %v188_v34 = vld [vmem:[%s891_s30 + $0x190] sm:$0xff]  ;;  %436 = vst [vmem:[%s901_s27 + $0x150] sm:$0xff] %v308_v23  ;;  %437 = vst [vmem:[%s901_s27 + $0x158] sm:$0xff] %v309_v24  ;;  %v314_v35 = vmax.f32 %v186_v32, 0.0  ;;  %v315_v36 = vmax.f32 %v187_v33, 0.0  ;;  %v189_v38 = vld [vmem:[%s891_s30 + $0x198] sm:$0xff] }
  0x4e   : > { %438 = vst [vmem:[%s901_s27 + $0x160] sm:$0xff] %v310_v25  ;;  %v316_v37 = vmax.f32 %v188_v34, 0.0  ;;  %v190_v39 = vld [vmem:[%s891_s30 + $0x1a0] sm:$0xff]  ;;  %v191_v40 = vld [vmem:[%s891_s30 + $0x1a8] sm:$0xff]  ;;  %439 = vst [vmem:[%s901_s27 + $0x168] sm:$0xff] %v311_v29  ;;  %v317_v41 = vmax.f32 %v189_v38, 0.0 }
  0x4f   : > { %440 = vst [vmem:[%s901_s27 + $0x170] sm:$0xff] %v312_v30  ;;  %441 = vst [vmem:[%s901_s27 + $0x178] sm:$0xff] %v313_v31  ;;  %v318_v42 = vmax.f32 %v190_v39, 0.0  ;;  %v319_v43 = vmax.f32 %v191_v40, 0.0  ;;  %v192_v44 = vld [vmem:[%s891_s30 + $0x1b0] sm:$0xff]  ;;  %v193_v45 = vld [vmem:[%s891_s30 + $0x1b8] sm:$0xff] }
  0x50   : > { %v194_v46 = vld [vmem:[%s891_s30 + $0x1c0] sm:$0xff]  ;;  %442 = vst [vmem:[%s901_s27 + $0x180] sm:$0xff] %v314_v35  ;;  %443 = vst [vmem:[%s901_s27 + $0x188] sm:$0xff] %v315_v36  ;;  %v320_v47 = vmax.f32 %v192_v44, 0.0  ;;  %v321_v48 = vmax.f32 %v193_v45, 0.0  ;;  %v195_v50 = vld [vmem:[%s891_s30 + $0x1c8] sm:$0xff] }
  0x51   : > { %444 = vst [vmem:[%s901_s27 + $0x190] sm:$0xff] %v316_v37  ;;  %v322_v49 = vmax.f32 %v194_v46, 0.0  ;;  %v196_v51 = vld [vmem:[%s891_s30 + $0x1d0] sm:$0xff]  ;;  %v197_v52 = vld [vmem:[%s891_s30 + $0x1d8] sm:$0xff]  ;;  %445 = vst [vmem:[%s901_s27 + $0x198] sm:$0xff] %v317_v41  ;;  %v323_v53 = vmax.f32 %v195_v50, 0.0 }
  0x52   : > { %446 = vst [vmem:[%s901_s27 + $0x1a0] sm:$0xff] %v318_v42  ;;  %447 = vst [vmem:[%s901_s27 + $0x1a8] sm:$0xff] %v319_v43  ;;  %v324_v54 = vmax.f32 %v196_v51, 0.0  ;;  %v325_v55 = vmax.f32 %v197_v52, 0.0  ;;  %v198_v56 = vld [vmem:[%s891_s30 + $0x1e0] sm:$0xff]  ;;  %v199_v57 = vld [vmem:[%s891_s30 + $0x1e8] sm:$0xff] }
  0x53   : > { %v200_v58 = vld [vmem:[%s891_s30 + $0x1f0] sm:$0xff]  ;;  %448 = vst [vmem:[%s901_s27 + $0x1b0] sm:$0xff] %v320_v47  ;;  %449 = vst [vmem:[%s901_s27 + $0x1b8] sm:$0xff] %v321_v48  ;;  %v326_v59 = vmax.f32 %v198_v56, 0.0  ;;  %v327_v60 = vmax.f32 %v199_v57, 0.0  ;;  %v201_v62 = vld [vmem:[%s891_s30 + $0x1f8] sm:$0xff] }
  0x54   : > { %450 = vst [vmem:[%s901_s27 + $0x1c0] sm:$0xff] %v322_v49  ;;  %v328_v61 = vmax.f32 %v200_v58, 0.0  ;;  %v202_v63 = vld [vmem:[%s891_s30 + $0x200] sm:$0xff]  ;;  %v203_v0 = vld [vmem:[%s891_s30 + $0x208] sm:$0xff]  ;;  %451 = vst [vmem:[%s901_s27 + $0x1c8] sm:$0xff] %v323_v53  ;;  %v329_v1 = vmax.f32 %v201_v62, 0.0 }
  0x55   : > { %452 = vst [vmem:[%s901_s27 + $0x1d0] sm:$0xff] %v324_v54  ;;  %453 = vst [vmem:[%s901_s27 + $0x1d8] sm:$0xff] %v325_v55  ;;  %v330_v2 = vmax.f32 %v202_v63, 0.0  ;;  %v331_v3 = vmax.f32 %v203_v0, 0.0  ;;  %v204_v4 = vld [vmem:[%s891_s30 + $0x210] sm:$0xff]  ;;  %v205_v5 = vld [vmem:[%s891_s30 + $0x218] sm:$0xff] }
  0x56   : > { %v206_v6 = vld [vmem:[%s891_s30 + $0x220] sm:$0xff]  ;;  %454 = vst [vmem:[%s901_s27 + $0x1e0] sm:$0xff] %v326_v59  ;;  %455 = vst [vmem:[%s901_s27 + $0x1e8] sm:$0xff] %v327_v60  ;;  %v332_v7 = vmax.f32 %v204_v4, 0.0  ;;  %v333_v8 = vmax.f32 %v205_v5, 0.0  ;;  %v207_v10 = vld [vmem:[%s891_s30 + $0x228] sm:$0xff] }
  0x57   : > { %456 = vst [vmem:[%s901_s27 + $0x1f0] sm:$0xff] %v328_v61  ;;  %v334_v9 = vmax.f32 %v206_v6, 0.0  ;;  %v208_v11 = vld [vmem:[%s891_s30 + $0x230] sm:$0xff]  ;;  %v209_v12 = vld [vmem:[%s891_s30 + $0x238] sm:$0xff]  ;;  %457 = vst [vmem:[%s901_s27 + $0x1f8] sm:$0xff] %v329_v1  ;;  %v335_v13 = vmax.f32 %v207_v10, 0.0 }
  0x58   : > { %458 = vst [vmem:[%s901_s27 + $0x200] sm:$0xff] %v330_v2  ;;  %459 = vst [vmem:[%s901_s27 + $0x208] sm:$0xff] %v331_v3  ;;  %v336_v14 = vmax.f32 %v208_v11, 0.0  ;;  %v337_v15 = vmax.f32 %v209_v12, 0.0  ;;  %v210_v16 = vld [vmem:[%s891_s30 + $0x240] sm:$0xff]  ;;  %v211_v17 = vld [vmem:[%s891_s30 + $0x248] sm:$0xff] }
  0x59   : > { %v212_v18 = vld [vmem:[%s891_s30 + $0x250] sm:$0xff]  ;;  %460 = vst [vmem:[%s901_s27 + $0x210] sm:$0xff] %v332_v7  ;;  %461 = vst [vmem:[%s901_s27 + $0x218] sm:$0xff] %v333_v8  ;;  %v338_v19 = vmax.f32 %v210_v16, 0.0  ;;  %v339_v20 = vmax.f32 %v211_v17, 0.0  ;;  %v213_v22 = vld [vmem:[%s891_s30 + $0x258] sm:$0xff] }
  0x5a   : > { %462 = vst [vmem:[%s901_s27 + $0x220] sm:$0xff] %v334_v9  ;;  %v340_v21 = vmax.f32 %v212_v18, 0.0  ;;  %v214_v23 = vld [vmem:[%s891_s30 + $0x260] sm:$0xff]  ;;  %v215_v24 = vld [vmem:[%s891_s30 + $0x268] sm:$0xff]  ;;  %463 = vst [vmem:[%s901_s27 + $0x228] sm:$0xff] %v335_v13  ;;  %v341_v25 = vmax.f32 %v213_v22, 0.0 }
  0x5b   : > { %464 = vst [vmem:[%s901_s27 + $0x230] sm:$0xff] %v336_v14  ;;  %465 = vst [vmem:[%s901_s27 + $0x238] sm:$0xff] %v337_v15  ;;  %v342_v26 = vmax.f32 %v214_v23, 0.0  ;;  %v343_v27 = vmax.f32 %v215_v24, 0.0  ;;  %v216_v28 = vld [vmem:[%s891_s30 + $0x270] sm:$0xff]  ;;  %v217_v29 = vld [vmem:[%s891_s30 + $0x278] sm:$0xff] }
  0x5c   : > { %v218_v30 = vld [vmem:[%s891_s30 + $0x280] sm:$0xff]  ;;  %466 = vst [vmem:[%s901_s27 + $0x240] sm:$0xff] %v338_v19  ;;  %467 = vst [vmem:[%s901_s27 + $0x248] sm:$0xff] %v339_v20  ;;  %v344_v31 = vmax.f32 %v216_v28, 0.0  ;;  %v345_v32 = vmax.f32 %v217_v29, 0.0  ;;  %v219_v34 = vld [vmem:[%s891_s30 + $0x288] sm:$0xff] }
  0x5d   : > { %468 = vst [vmem:[%s901_s27 + $0x250] sm:$0xff] %v340_v21  ;;  %v346_v33 = vmax.f32 %v218_v30, 0.0  ;;  %v220_v35 = vld [vmem:[%s891_s30 + $0x290] sm:$0xff]  ;;  %v221_v36 = vld [vmem:[%s891_s30 + $0x298] sm:$0xff]  ;;  %469 = vst [vmem:[%s901_s27 + $0x258] sm:$0xff] %v341_v25  ;;  %v347_v37 = vmax.f32 %v219_v34, 0.0 }
  0x5e   : > { %470 = vst [vmem:[%s901_s27 + $0x260] sm:$0xff] %v342_v26  ;;  %471 = vst [vmem:[%s901_s27 + $0x268] sm:$0xff] %v343_v27  ;;  %v348_v38 = vmax.f32 %v220_v35, 0.0  ;;  %v349_v39 = vmax.f32 %v221_v36, 0.0  ;;  %v222_v40 = vld [vmem:[%s891_s30 + $0x2a0] sm:$0xff]  ;;  %v223_v41 = vld [vmem:[%s891_s30 + $0x2a8] sm:$0xff] }
  0x5f   : > { %v224_v42 = vld [vmem:[%s891_s30 + $0x2b0] sm:$0xff]  ;;  %472 = vst [vmem:[%s901_s27 + $0x270] sm:$0xff] %v344_v31  ;;  %473 = vst [vmem:[%s901_s27 + $0x278] sm:$0xff] %v345_v32  ;;  %v350_v43 = vmax.f32 %v222_v40, 0.0  ;;  %v351_v44 = vmax.f32 %v223_v41, 0.0  ;;  %v225_v46 = vld [vmem:[%s891_s30 + $0x2b8] sm:$0xff] }
  0x60   : > { %474 = vst [vmem:[%s901_s27 + $0x280] sm:$0xff] %v346_v33  ;;  %v352_v45 = vmax.f32 %v224_v42, 0.0  ;;  %v226_v47 = vld [vmem:[%s891_s30 + $0x2c0] sm:$0xff]  ;;  %v227_v48 = vld [vmem:[%s891_s30 + $0x2c8] sm:$0xff]  ;;  %475 = vst [vmem:[%s901_s27 + $0x288] sm:$0xff] %v347_v37  ;;  %v353_v49 = vmax.f32 %v225_v46, 0.0 }
  0x61   : > { %476 = vst [vmem:[%s901_s27 + $0x290] sm:$0xff] %v348_v38  ;;  %477 = vst [vmem:[%s901_s27 + $0x298] sm:$0xff] %v349_v39  ;;  %v354_v50 = vmax.f32 %v226_v47, 0.0  ;;  %v355_v51 = vmax.f32 %v227_v48, 0.0  ;;  %v228_v52 = vld [vmem:[%s891_s30 + $0x2d0] sm:$0xff]  ;;  %v229_v53 = vld [vmem:[%s891_s30 + $0x2d8] sm:$0xff] }
  0x62   : > { %v230_v54 = vld [vmem:[%s891_s30 + $0x2e0] sm:$0xff]  ;;  %478 = vst [vmem:[%s901_s27 + $0x2a0] sm:$0xff] %v350_v43  ;;  %479 = vst [vmem:[%s901_s27 + $0x2a8] sm:$0xff] %v351_v44  ;;  %v356_v55 = vmax.f32 %v228_v52, 0.0  ;;  %v357_v56 = vmax.f32 %v229_v53, 0.0  ;;  %v231_v58 = vld [vmem:[%s891_s30 + $0x2e8] sm:$0xff] }
  0x63   : > { %480 = vst [vmem:[%s901_s27 + $0x2b0] sm:$0xff] %v352_v45  ;;  %v358_v57 = vmax.f32 %v230_v54, 0.0  ;;  %v232_v59 = vld [vmem:[%s891_s30 + $0x2f0] sm:$0xff]  ;;  %v233_v60 = vld [vmem:[%s891_s30 + $0x2f8] sm:$0xff]  ;;  %481 = vst [vmem:[%s901_s27 + $0x2b8] sm:$0xff] %v353_v49  ;;  %v359_v61 = vmax.f32 %v231_v58, 0.0 }
  0x64   : > { %482 = vst [vmem:[%s901_s27 + $0x2c0] sm:$0xff] %v354_v50  ;;  %483 = vst [vmem:[%s901_s27 + $0x2c8] sm:$0xff] %v355_v51  ;;  %v360_v62 = vmax.f32 %v232_v59, 0.0  ;;  %v361_v63 = vmax.f32 %v233_v60, 0.0  ;;  %v234_v0 = vld [vmem:[%s891_s30 + $0x300] sm:$0xff]  ;;  %v235_v1 = vld [vmem:[%s891_s30 + $0x308] sm:$0xff] }
  0x65   : > { %v236_v2 = vld [vmem:[%s891_s30 + $0x310] sm:$0xff]  ;;  %484 = vst [vmem:[%s901_s27 + $0x2d0] sm:$0xff] %v356_v55  ;;  %485 = vst [vmem:[%s901_s27 + $0x2d8] sm:$0xff] %v357_v56  ;;  %v362_v3 = vmax.f32 %v234_v0, 0.0  ;;  %v363_v4 = vmax.f32 %v235_v1, 0.0  ;;  %v237_v6 = vld [vmem:[%s891_s30 + $0x318] sm:$0xff] }
  0x66   : > { %486 = vst [vmem:[%s901_s27 + $0x2e0] sm:$0xff] %v358_v57  ;;  %v364_v5 = vmax.f32 %v236_v2, 0.0  ;;  %v238_v7 = vld [vmem:[%s891_s30 + $0x320] sm:$0xff]  ;;  %v239_v8 = vld [vmem:[%s891_s30 + $0x328] sm:$0xff]  ;;  %487 = vst [vmem:[%s901_s27 + $0x2e8] sm:$0xff] %v359_v61  ;;  %v365_v9 = vmax.f32 %v237_v6, 0.0 }
  0x67   : > { %488 = vst [vmem:[%s901_s27 + $0x2f0] sm:$0xff] %v360_v62  ;;  %489 = vst [vmem:[%s901_s27 + $0x2f8] sm:$0xff] %v361_v63  ;;  %v366_v10 = vmax.f32 %v238_v7, 0.0  ;;  %v367_v11 = vmax.f32 %v239_v8, 0.0  ;;  %v240_v12 = vld [vmem:[%s891_s30 + $0x330] sm:$0xff]  ;;  %v241_v13 = vld [vmem:[%s891_s30 + $0x338] sm:$0xff] }
  0x68   : > { %v242_v14 = vld [vmem:[%s891_s30 + $0x340] sm:$0xff]  ;;  %490 = vst [vmem:[%s901_s27 + $0x300] sm:$0xff] %v362_v3  ;;  %491 = vst [vmem:[%s901_s27 + $0x308] sm:$0xff] %v363_v4  ;;  %v368_v15 = vmax.f32 %v240_v12, 0.0  ;;  %v369_v16 = vmax.f32 %v241_v13, 0.0  ;;  %v243_v18 = vld [vmem:[%s891_s30 + $0x348] sm:$0xff] }
  0x69   : > { %492 = vst [vmem:[%s901_s27 + $0x310] sm:$0xff] %v364_v5  ;;  %v370_v17 = vmax.f32 %v242_v14, 0.0  ;;  %v244_v19 = vld [vmem:[%s891_s30 + $0x350] sm:$0xff]  ;;  %v245_v20 = vld [vmem:[%s891_s30 + $0x358] sm:$0xff]  ;;  %493 = vst [vmem:[%s901_s27 + $0x318] sm:$0xff] %v365_v9  ;;  %v371_v21 = vmax.f32 %v243_v18, 0.0 }
  0x6a   : > { %494 = vst [vmem:[%s901_s27 + $0x320] sm:$0xff] %v366_v10  ;;  %495 = vst [vmem:[%s901_s27 + $0x328] sm:$0xff] %v367_v11  ;;  %v372_v22 = vmax.f32 %v244_v19, 0.0  ;;  %v373_v23 = vmax.f32 %v245_v20, 0.0  ;;  %v246_v24 = vld [vmem:[%s891_s30 + $0x360] sm:$0xff]  ;;  %v247_v25 = vld [vmem:[%s891_s30 + $0x368] sm:$0xff] }
  0x6b   : > { %v248_v26 = vld [vmem:[%s891_s30 + $0x370] sm:$0xff]  ;;  %496 = vst [vmem:[%s901_s27 + $0x330] sm:$0xff] %v368_v15  ;;  %497 = vst [vmem:[%s901_s27 + $0x338] sm:$0xff] %v369_v16  ;;  %v374_v27 = vmax.f32 %v246_v24, 0.0  ;;  %v375_v28 = vmax.f32 %v247_v25, 0.0  ;;  %v249_v30 = vld [vmem:[%s891_s30 + $0x378] sm:$0xff] }
  0x6c   : > { %498 = vst [vmem:[%s901_s27 + $0x340] sm:$0xff] %v370_v17  ;;  %v376_v29 = vmax.f32 %v248_v26, 0.0  ;;  %v250_v31 = vld [vmem:[%s891_s30 + $0x380] sm:$0xff]  ;;  %v251_v32 = vld [vmem:[%s891_s30 + $0x388] sm:$0xff]  ;;  %499 = vst [vmem:[%s901_s27 + $0x348] sm:$0xff] %v371_v21  ;;  %v377_v33 = vmax.f32 %v249_v30, 0.0 }
  0x6d   : > { %500 = vst [vmem:[%s901_s27 + $0x350] sm:$0xff] %v372_v22  ;;  %501 = vst [vmem:[%s901_s27 + $0x358] sm:$0xff] %v373_v23  ;;  %v378_v34 = vmax.f32 %v250_v31, 0.0  ;;  %v379_v35 = vmax.f32 %v251_v32, 0.0  ;;  %v252_v36 = vld [vmem:[%s891_s30 + $0x390] sm:$0xff]  ;;  %v253_v37 = vld [vmem:[%s891_s30 + $0x398] sm:$0xff] }
  0x6e   : > { %v254_v38 = vld [vmem:[%s891_s30 + $0x3a0] sm:$0xff]  ;;  %502 = vst [vmem:[%s901_s27 + $0x360] sm:$0xff] %v374_v27  ;;  %503 = vst [vmem:[%s901_s27 + $0x368] sm:$0xff] %v375_v28  ;;  %v380_v39 = vmax.f32 %v252_v36, 0.0  ;;  %v381_v40 = vmax.f32 %v253_v37, 0.0  ;;  %v255_v42 = vld [vmem:[%s891_s30 + $0x3a8] sm:$0xff] }
  0x6f   : > { %504 = vst [vmem:[%s901_s27 + $0x370] sm:$0xff] %v376_v29  ;;  %v382_v41 = vmax.f32 %v254_v38, 0.0  ;;  %v256_v43 = vld [vmem:[%s891_s30 + $0x3b0] sm:$0xff]  ;;  %v257_v44 = vld [vmem:[%s891_s30 + $0x3b8] sm:$0xff]  ;;  %505 = vst [vmem:[%s901_s27 + $0x378] sm:$0xff] %v377_v33  ;;  %v383_v45 = vmax.f32 %v255_v42, 0.0 }
  0x70   : > { %506 = vst [vmem:[%s901_s27 + $0x380] sm:$0xff] %v378_v34  ;;  %507 = vst [vmem:[%s901_s27 + $0x388] sm:$0xff] %v379_v35  ;;  %v384_v46 = vmax.f32 %v256_v43, 0.0  ;;  %v385_v47 = vmax.f32 %v257_v44, 0.0  ;;  %v258_v48 = vld [vmem:[%s891_s30 + $0x3c0] sm:$0xff]  ;;  %v259_v49 = vld [vmem:[%s891_s30 + $0x3c8] sm:$0xff] }
  0x71   : > { %v260_v50 = vld [vmem:[%s891_s30 + $0x3d0] sm:$0xff]  ;;  %508 = vst [vmem:[%s901_s27 + $0x390] sm:$0xff] %v380_v39  ;;  %509 = vst [vmem:[%s901_s27 + $0x398] sm:$0xff] %v381_v40  ;;  %v386_v51 = vmax.f32 %v258_v48, 0.0  ;;  %v387_v52 = vmax.f32 %v259_v49, 0.0  ;;  %v261_v54 = vld [vmem:[%s891_s30 + $0x3d8] sm:$0xff] }
  0x72   : > { %510 = vst [vmem:[%s901_s27 + $0x3a0] sm:$0xff] %v382_v41  ;;  %v388_v53 = vmax.f32 %v260_v50, 0.0  ;;  %v262_v55 = vld [vmem:[%s891_s30 + $0x3e0] sm:$0xff]  ;;  %v263_v56 = vld [vmem:[%s891_s30 + $0x3e8] sm:$0xff]  ;;  %511 = vst [vmem:[%s901_s27 + $0x3a8] sm:$0xff] %v383_v45  ;;  %v389_v57 = vmax.f32 %v261_v54, 0.0 }
  0x73   : > { %512 = vst [vmem:[%s901_s27 + $0x3b0] sm:$0xff] %v384_v46  ;;  %513 = vst [vmem:[%s901_s27 + $0x3b8] sm:$0xff] %v385_v47  ;;  %v390_v58 = vmax.f32 %v262_v55, 0.0  ;;  %v391_v59 = vmax.f32 %v263_v56, 0.0  ;;  %v264_v60 = vld [vmem:[%s891_s30 + $0x3f0] sm:$0xff]  ;;  %v265_v61 = vld [vmem:[%s891_s30 + $0x3f8] sm:$0xff] }
  0x74   : > { %514 = vst [vmem:[%s901_s27 + $0x3c0] sm:$0xff] %v386_v51  ;;  %515 = vst [vmem:[%s901_s27 + $0x3c8] sm:$0xff] %v387_v52  ;;  %v392_v62 = vmax.f32 %v264_v60, 0.0  ;;  %v393_v63 = vmax.f32 %v265_v61, 0.0  ;;  %s523_s10 = scalar_lea.sflag [#allocation4], %s887_s23  ;;  %s708_s3 = scalar_lea.vmem %s1158_s17, 16384 }
  0x75   : > { %516 = vst [vmem:[%s901_s27 + $0x3d0] sm:$0xff] %v388_v53  ;;  %517 = vst [vmem:[%s901_s27 + $0x3d8] sm:$0xff] %v389_v57  ;;  %p709_p11 = scmp.ne.s32.totalorder %s1158_s17, %s708_s3  ;;  %p1219_p12 = scmp.ne.s32.totalorder %s1215_s18, 0 }
  0x76   : > { %518 = vst [vmem:[%s901_s27 + $0x3e0] sm:$0xff] %v390_v58  ;;  %519 = vst [vmem:[%s901_s27 + $0x3e8] sm:$0xff] %v391_v59  ;;  %s777_s4 = smov [#allocation5]  }
  0x77   : > { %520 = vst [vmem:[%s901_s27 + $0x3f0] sm:$0xff] %v392_v62  ;;  %521 = vst [vmem:[%s901_s27 + $0x3f8] sm:$0xff] %v393_v63  ;;  %p710_p13 = pnand %p709_p11, %p1219_p12  ;;  %s712_s5 = sshll.u32 %s777_s4, 4  ;;  %s713_s5 = int_to_ptr.vmem [resolvable:$false] %s712_s5 }
  0x78   : > { %s714_s11 = scalar_lea.vmem %s713_s5, 32768  ;;  %p715_p5 = scmp.lt.s32.totalorder %s1158_s17, %s713_s5 }
  0x79   : > { %p711_p4 = pneg %p710_p13  ;;  %p716_p7 = scmp.lt.s32.totalorder %s714_s11, %s708_s3 }
  0x7b   : > { %p717_p8 = por %p716_p7, %p715_p5 }
  0x7d   : > { %p718_p10 = pnand %p717_p8, %p711_p4 }
  0x7f   : > { %721 = shalt.err (!%p718_p10)
}
  0x80   : > { %s722_s13 = scalar_lea.hbm %s1154_s2, 16384  ;;  %s726_s20 = scalar_lea.hbm %s1210_s1, 32768 }
  0x81   : > { %p723_p0 = scmp.ne.s32.totalorder %s1154_s2, %s722_s13  ;;  %p727_p1 = scmp.lt.s32.totalorder %s1154_s2, %s1210_s1 }
  0x82   : > { %p728_p3 = scmp.lt.s32.totalorder %s726_s20, %s722_s13 }
  0x83   : > { %p724_p2 = pnand %p723_p0, %p1219_p12 }
  0x84   : > { %p729_p6 = por %p728_p3, %p727_p1 }
  0x85   : > { %p725_p9 = pneg %p724_p2 }
  0x87   : > { %p730_p11 = pnand %p729_p6, %p725_p9 }
  0x89   : > { %733 = shalt.err (!%p730_p11)
}
  0x8a   : > { %s778_s24 = smov 4096   ;;  %s779_s26 = smov 256  }
  0x8b   : > { %632 = dma.vmem_to_hbm [thread:$0]  (%p1219_p12), %s1158_s17, 16384, %s1154_s2, %s523_s10, %s778_s24, %s778_s24, %s779_s26  }
  0x8c PF: > { %s552_s30 = sand.u32 1, %s760_s6   ;;  %p1220_p13 = scmp.ne.s32.totalorder %s1216_s19, 0 }
  0x8d   : > { %p1221_p4 = scmp.ge.s32.totalorder %s772_s9, 2  ;;  %s553_s25 = scalar_lea.sflag [#allocation4], %s552_s30 }
  0x8f   : > { %p639_p5 = pnand %p1221_p4, %p1220_p13 }
  0x91   : > { %p640_p7 = pneg %p639_p5 }
  0x93   : > { %755 = dma.done.wait (%p640_p7), %s553_s25, 16384  }
  0x94   : > { %757 = vsyncadd (%p640_p7), %s553_s25, 4294950912  ;;  %p14_p8 = scmp.ge.s32.totalorder %s815_s12, 4   ;;  %s1222_s6 = smov %s764_s7 }
  0x95   : > { %s1223_s7 = smov %s768_s8  ;;  %s1224_s8 = smov %s827_s15 }
  0x96   : > { %s1225_s9 = smov %s815_s12  ;;  %16 = sbr.rel (!%p14_p8) target bundleno = 5 (0x5), region = 69 }
  0x9b   :  { %558 = vsyncpa [#allocation3], 1 }
  0x9c   :  { %560 = vsyncpa [#allocation3 + $0x1], 1 }
  0x9d   :  { %561 = vsyncpa [#allocation4], 1 }
  0x9e   :  { %563 = vsyncpa [#allocation4 + $0x1], 1 }

</bundles_post_ra>
